<compile_context>
chip_gen: v6e
topology: v6e:2x2x1
jax: 0.10.0
libtpu: 0.0.40
codegen_flags: <defaults>
</compile_context>

<pallas_src>
import jax
import jax.numpy as jnp
from jax.experimental import pallas as pl
from jax.experimental.pallas import tpu as pltpu

AXIS = 1            # module hyperparameter -> Cin = 7 * AXIS
CIN = 7 * AXIS
COUT = 32
K = 3
L = 36              # classifier assumes 32 * (36 // 3) features
P = L // 3
NUM_CLASSES = 5
N = 2               # batch


def myconvnet_kernel(xim_ref, wcol_ref, bc_ref, w1_ref, mask_ref, rsel_ref,
                     csum_ref, bf_ref, o_ref):
    # xim : (N*L, K*Cin)  im2col'd padded activations, row = n*L + l
    # wcol: (K*Cin, Cout) conv weight, row = k*Cin + cin
    # bc  : (1, Cout)     conv bias
    # w1  : (Cout, P*NC)  fused avgpool(1/3) + FC weight, col = p*NC + f
    # mask: (N*L, P*NC)   1.0 where column's p == row's l // 3
    # rsel: (N, N*L)      per-batch row-sum selector
    # csum: (P*NC, NC)    sum-over-p selector (col % NC == f)
    # bf  : (1, NC)       FC bias
    # o   : (N, NC)       logits
    # TODO(synk): nn.Dropout2d(p=0.5) is train-mode channel dropout; identity here
    # (eval semantics).  Could be added with pltpu.prng_* if training is needed.
    y = jnp.dot(xim_ref[...], wcol_ref[...],
                preferred_element_type=jnp.float32)            # conv as ONE matmul
    y = jnp.maximum(y + bc_ref[...], 0.0)                      # bias + ReLU  (N*L, Cout)

    b = jnp.dot(y, w1_ref[...],
                preferred_element_type=jnp.float32) * mask_ref[...]   # (N*L, P*NC)
    t = jnp.dot(rsel_ref[...], b,
                preferred_element_type=jnp.float32)                   # (N, P*NC)
    logits = jnp.dot(t, csum_ref[...],
                     preferred_element_type=jnp.float32) + bf_ref[...]  # (N, NC)

    o_ref[...] = logits.astype(o_ref.dtype)                    # single coalesced store


@jax.jit
def myconvnet_forward(x_ncl, w_conv, b_conv, w_fc, b_fc):
    """x_ncl: (N, Cin, L) float32 (PyTorch NCL layout)."""
    n, cin, length = x_ncl.shape
    cout, _, k = w_conv.shape
    nc = w_fc.shape[0]
    n_pool = length // 3

    # ---- Glue / constant packing (plain JAX, outside the kernel). ----
    x_nlc = jnp.transpose(x_ncl, (0, 2, 1))                    # (N, L, Cin)
    xpad = jnp.pad(x_nlc, ((0, 0), (1, 1), (0, 0)))            # (N, L+2, Cin)
    xim = jnp.concatenate([xpad[:, t:t + length, :] for t in range(k)],
                          axis=-1).reshape(n * length, k * cin)  # (N*L, K*Cin)

    wcol = jnp.transpose(w_conv, (2, 1, 0)).reshape(k * cin, cout)   # (K*Cin, Cout)
    bc = b_conv.reshape(1, cout)

    # Fused AvgPool(1/3) + flatten + Linear weight: w1[c, p*NC + f] = W_fc[f, c*P + p]/3
    w1 = jnp.transpose(w_fc.reshape(nc, cout, n_pool), (1, 2, 0)) \
            .reshape(cout, n_pool * nc) / 3.0
    bf = b_fc.reshape(1, nc)

    # Constants expressing "pool window p == l//3", the per-batch row sum and the
    # sum-over-p as dense ops (built once here, NOT per kernel call).
    l_idx = jnp.arange(n * length, dtype=jnp.int32) % length           # row -> l
    p_idx = jnp.arange(n_pool * nc, dtype=jnp.int32) // nc             # col -> p
    mask = (l_idx[:, None] // 3 == p_idx[None, :]).astype(jnp.float32)  # (N*L, P*NC)

    row_batch = jnp.arange(n * length, dtype=jnp.int32) // length
    rsel = (jnp.arange(n, dtype=jnp.int32)[:, None] == row_batch[None, :]
            ).astype(jnp.float32)                                       # (N, N*L)

    f_idx = jnp.arange(n_pool * nc, dtype=jnp.int32) % nc
    csum = (f_idx[:, None] == jnp.arange(nc, dtype=jnp.int32)[None, :]
            ).astype(jnp.float32)                                       # (P*NC, NC)

    operands = (xim, wcol, bc, w1, mask, rsel, csum, bf)
    flops = (2 * (n * length) * (k * cin) * cout
             + 2 * (n * length) * cout * (n_pool * nc)
             + 2 * n * (n * length) * (n_pool * nc)
             + 2 * n * (n_pool * nc) * nc)
    bytes_accessed = sum(int(a.size) * 4 for a in operands) + n * nc * 4

    # No grid: the whole working set is a few KiB and lives in VMEM.
    # TODO(synk): if batch/AXIS ever scales, add a batch grid with
    # dimension_semantics=("parallel",) so v7x's second TensorCore is used.
    vmem_spec = pl.BlockSpec(memory_space=pltpu.MemorySpace.VMEM)
    return pl.pallas_call(
        myconvnet_kernel,
        out_shape=jax.ShapeDtypeStruct((n, nc), jnp.float32),
        in_specs=[vmem_spec] * len(operands),
        out_specs=vmem_spec,
        cost_estimate=pl.CostEstimate(flops=flops, transcendentals=0,
                                      bytes_accessed=bytes_accessed),
    )(*operands)


def reference_forward(x_ncl, w_conv, b_conv, w_fc, b_fc):
    """Pure-JAX reference matching the PyTorch forward (eval mode)."""
    y = jax.lax.conv_general_dilated(
        x_ncl, w_conv, window_strides=(1,), padding=((1, 1),),
        dimension_numbers=("NCH", "OIH", "NCH"))
    y = y + b_conv[None, :, None]
    y = jnp.maximum(y, 0.0)
    n, c, length = y.shape
    pooled = y.reshape(n, c, length // 3, 3).mean(axis=-1)     # (N, C, P)
    flat = pooled.reshape(n, -1)                               # channel-major flatten
    return flat @ w_fc.T + b_fc[None, :]


if __name__ == "__main__":
    key = jax.random.PRNGKey(0)
    kx, kw1, kb1, kw2, kb2 = jax.random.split(key, 5)

    # Deterministic synthetic parameters (PyTorch-like uniform init scales).
    s1 = 1.0 / jnp.sqrt(CIN * K)
    w_conv = jax.random.uniform(kw1, (COUT, CIN, K), jnp.float32, -s1, s1)
    b_conv = jax.random.uniform(kb1, (COUT,), jnp.float32, -s1, s1)
    s2 = 1.0 / jnp.sqrt(COUT * P)
    w_fc = jax.random.uniform(kw2, (NUM_CLASSES, COUT * P), jnp.float32, -s2, s2)
    b_fc = jax.random.uniform(kb2, (NUM_CLASSES,), jnp.float32, -s2, s2)

    x = jax.random.normal(kx, (N, CIN, L), jnp.float32)        # (batch, 7*axis, 36)

    out = jax.block_until_ready(myconvnet_forward(x, w_conv, b_conv, w_fc, b_fc))
    ref = jax.block_until_ready(reference_forward(x, w_conv, b_conv, w_fc, b_fc))

    assert out.shape == (N, NUM_CLASSES)
    assert jnp.allclose(out, ref, atol=1e-4, rtol=1e-4), (out, ref)
    print("KERNEL_OK")
</pallas_src>

<mosaic_0001>
module attributes {stable_mosaic.version = 11 : i64} {
  func.func @myconvnet_kernel(%arg0: memref<72x21xf32, #tpu.memory_space<vmem>>, %arg1: memref<21x32xf32, #tpu.memory_space<vmem>>, %arg2: memref<1x32xf32, #tpu.memory_space<vmem>>, %arg3: memref<32x60xf32, #tpu.memory_space<vmem>>, %arg4: memref<72x60xf32, #tpu.memory_space<vmem>>, %arg5: memref<2x72xf32, #tpu.memory_space<vmem>>, %arg6: memref<60x5xf32, #tpu.memory_space<vmem>>, %arg7: memref<1x5xf32, #tpu.memory_space<vmem>>, %arg8: memref<2x5xf32, #tpu.memory_space<vmem>>) attributes {dimension_semantics = [], scalar_prefetch = 0 : i64, scratch_operands = 0 : i64, tpu.core_type = #tpu.core_type<tc>} {
    %c0 = arith.constant 0 : index
    %c0_0 = arith.constant 0 : index
    %0 = vector.load %arg0[%c0, %c0_0] : memref<72x21xf32, #tpu.memory_space<vmem>>, vector<72x21xf32>
    %c0_1 = arith.constant 0 : index
    %c0_2 = arith.constant 0 : index
    %1 = vector.load %arg1[%c0_1, %c0_2] : memref<21x32xf32, #tpu.memory_space<vmem>>, vector<21x32xf32>
    %cst = arith.constant dense<0.000000e+00> : vector<72x32xf32>
    %2 = tpu.matmul %0, %1, %cst {dimension_numbers = #tpu.dot_dimension_numbers<[1], [0], [0], [1], [0, 0, 1, 1], [], []>} : vector<72x21xf32>, vector<21x32xf32>, vector<72x32xf32> -> vector<72x32xf32>
    %c0_3 = arith.constant 0 : index
    %c0_4 = arith.constant 0 : index
    %3 = vector.load %arg2[%c0_3, %c0_4] : memref<1x32xf32, #tpu.memory_space<vmem>>, vector<1x32xf32>
    %4 = vector.broadcast %3 : vector<1x32xf32> to vector<72x32xf32>
    %5 = arith.addf %2, %4 : vector<72x32xf32>
    %cst_5 = arith.constant 0.000000e+00 : f32
    %6 = vector.broadcast %cst_5 : f32 to vector<72x32xf32>
    %7 = arith.maximumf %5, %6 : vector<72x32xf32>
    %c0_6 = arith.constant 0 : index
    %c0_7 = arith.constant 0 : index
    %8 = vector.load %arg3[%c0_6, %c0_7] : memref<32x60xf32, #tpu.memory_space<vmem>>, vector<32x60xf32>
    %cst_8 = arith.constant dense<0.000000e+00> : vector<72x60xf32>
    %9 = tpu.matmul %7, %8, %cst_8 {dimension_numbers = #tpu.dot_dimension_numbers<[1], [0], [0], [1], [0, 0, 1, 1], [], []>} : vector<72x32xf32>, vector<32x60xf32>, vector<72x60xf32> -> vector<72x60xf32>
    %c0_9 = arith.constant 0 : index
    %c0_10 = arith.constant 0 : index
    %10 = vector.load %arg4[%c0_9, %c0_10] : memref<72x60xf32, #tpu.memory_space<vmem>>, vector<72x60xf32>
    %11 = arith.mulf %9, %10 : vector<72x60xf32>
    %c0_11 = arith.constant 0 : index
    %c0_12 = arith.constant 0 : index
    %12 = vector.load %arg5[%c0_11, %c0_12] : memref<2x72xf32, #tpu.memory_space<vmem>>, vector<2x72xf32>
    %cst_13 = arith.constant dense<0.000000e+00> : vector<2x60xf32>
    %13 = tpu.matmul %12, %11, %cst_13 {dimension_numbers = #tpu.dot_dimension_numbers<[1], [0], [0], [1], [0, 0, 1, 1], [], []>} : vector<2x72xf32>, vector<72x60xf32>, vector<2x60xf32> -> vector<2x60xf32>
    %c0_14 = arith.constant 0 : index
    %c0_15 = arith.constant 0 : index
    %14 = vector.load %arg6[%c0_14, %c0_15] : memref<60x5xf32, #tpu.memory_space<vmem>>, vector<60x5xf32>
    %cst_16 = arith.constant dense<0.000000e+00> : vector<2x5xf32>
    %15 = tpu.matmul %13, %14, %cst_16 {dimension_numbers = #tpu.dot_dimension_numbers<[1], [0], [0], [1], [0, 0, 1, 1], [], []>} : vector<2x60xf32>, vector<60x5xf32>, vector<2x5xf32> -> vector<2x5xf32>
    %c0_17 = arith.constant 0 : index
    %c0_18 = arith.constant 0 : index
    %16 = vector.load %arg7[%c0_17, %c0_18] : memref<1x5xf32, #tpu.memory_space<vmem>>, vector<1x5xf32>
    %17 = vector.broadcast %16 : vector<1x5xf32> to vector<2x5xf32>
    %18 = arith.addf %15, %17 : vector<2x5xf32>
    %c0_19 = arith.constant 0 : index
    %c0_20 = arith.constant 0 : index
    %19 = vector.load %arg8[%c0_19, %c0_20] : memref<2x5xf32, #tpu.memory_space<vmem>>, vector<2x5xf32>
    tpu.vector_store %arg8[%c0_19, %c0_20], %18 {strides = array<i32>} : memref<2x5xf32, #tpu.memory_space<vmem>>, vector<2x5xf32>,
    return
  }
}

</mosaic_0001>

<bundles_post_ra>
// kernel: myconvnet_forward.1
= control target key start
LH: loop header
LB: loop body
LE: loop exit
PB: predicated region body
PF: predicated region fallthrough
CT: control target
= control target key end

     0   :  { %vm77_vm0 = vcmask 1044480   ;;  %v745_v1 = vmov 0.0   ;;  %vm746_vm1 = vmmov 0   ;;  %vm49_vm2 = vcmask 171008   ;;  %s986_s0 = inlined_call_operand.vmem [shape: f32[72,21], index: 0, kind: input, shape index: {}]   ;;  %s987_s1 = inlined_call_operand.vmem [shape: f32[21,32], index: 1, kind: input, shape index: {}]   ;;  %s988_s2 = inlined_call_operand.vmem [shape: f32[1,32], index: 2, kind: input, shape index: {}]   ;;  %s989_s3 = inlined_call_operand.vmem [shape: f32[32,60], index: 3, kind: input, shape index: {}]   ;;  %s990_s4 = inlined_call_operand.vmem [shape: f32[72,60], index: 4, kind: input, shape index: {}]   ;;  %s991_s5 = inlined_call_operand.vmem [shape: f32[2,72], index: 5, kind: input, shape index: {}]   ;;  %s992_s6 = inlined_call_operand.vmem [shape: f32[60,5], index: 6, kind: input, shape index: {}]   ;;  %s993_s7 = inlined_call_operand.vmem [shape: f32[1,5], index: 7, kind: input, shape index: {}]   ;;  %s994_s8 = inlined_call_operand.hbm [shape: f32[2,5], index: 8, kind: output, shape index: {}]  }
   0x1   :  { %v41_v0 = vld [vmem:[%s987_s1 + $0x10] sm:$0x1f]  ;;  %612 = vmatprep.subr.mxu0 %v745_v1  ;;  %v40_v2 = vld [vmem:[%s987_s1 + $0x8] sm:$0xff]  ;;  %645 = vmatprep.subr.mxu1 %v745_v1  ;;  %v39_v3 = vld [vmem:[%s987_s1] sm:$0xff] }
   0x2   :  { %613 = vmatpush3.msk.msra.mxu0 %vm77_vm0, %v41_v0  ;;  %618 = vmatprep.mubr.msk.f32.mxu0 %vm746_vm1, %v745_v1  ;;  %v30_v4 = vld [vmem:[%s986_s0] sm:$0xff]  ;;  %v203_v5 = vld [vmem:[%s989_s3 + $0x18] sm:$0xff] }
   0x3   :  { %614 = vmatprep.subr.mxu0 %v745_v1  ;;  %653 = vmatprep.mubr.msk.f32.mxu1 %vm746_vm1, %v745_v1 }
   0x4   :  { %615 = vmatpush3.msra.mxu0 %v40_v2 }
   0x5   :  { %13 = vsyncpa [#allocation3], 0  ;;  %616 = vmatprep.subr.mxu0 %v745_v1  ;;  %646 = vmatpush3.msra.mxu1 %v203_v5  ;;  %v31_v6 = vld [vmem:[%s986_s0 + $0x8] sm:$0xff]  ;;  %v32_v7 = vld [vmem:[%s986_s0 + $0x10] sm:$0xff]  ;;  %vm204_vm3 = vcmask 261120   ;;  %vm454_vm4 = vcmask 1043456  }
   0x6   :  { %617 = vmatpush3.msra.mxu0 %v39_v3  ;;  %647 = vmatprep.subr.mxu1 %v745_v1  ;;  %v33_v8 = vld [vmem:[%s986_s0 + $0x18] sm:$0xff]  ;;  %v34_v9 = vld [vmem:[%s986_s0 + $0x20] sm:$0xff]  ;;  %v35_v10 = vld [vmem:[%s986_s0 + $0x28] sm:$0xff]  ;;  %vm361_vm5 = vcmask 588800   ;;  %vm450_vm6 = vcmask 490496   ;;  %s747_s22 = smov [#allocation2]  }
   0x7   :  { %619 = vmatmul.mubr.msk.f32.vlgmr.msra.gmra.mxu0 %vm49_vm2, %v30_v4  ;;  %680 = vmatprep.subr.mxu0 %v745_v1  ;;  %v36_v11 = vld [vmem:[%s986_s0 + $0x30] sm:$0xff]  ;;  %v37_v12 = vld [vmem:[%s986_s0 + $0x38] sm:$0xff]  ;;  %v38_v13 = vld [vmem:[%s986_s0 + $0x40] sm:$0xff]  ;;  %s536_s23 = sshll.u32 %s747_s22, 4  ;;  %vm528_vm7 = vcmask 33792   ;;  %s537_s23 = int_to_ptr.vmem [resolvable:$true] %s536_s23 }
   0x8   :  { %621 = vmatprep.mubr.msk.f32.mxu0 %vm746_vm1, %v745_v1  ;;  %v202_v14 = vld [vmem:[%s989_s3 + $0x10] sm:$0xff]  ;;  %v201_v15 = vld [vmem:[%s989_s3 + $0x8] sm:$0xff]  ;;  %v200_v16 = vld [vmem:[%s989_s3] sm:$0xff]  ;;  %p728_p1 = scmp.lt.s32.totalorder %s537_s23, %s537_s23 }
   0x9   :  { %648 = vmatpush3.msra.mxu1 %v202_v14  ;;  %v544_v17 = vld [vmem:[%s988_s2] ss:$0 sm:$0xff]  ;;  %v442_v54 = vld [vmem:[%s992_s6 + $0x38] sm:$0xf]  ;;  %v441_v55 = vld [vmem:[%s992_s6 + $0x30] sm:$0xff] }
   0xa   :  { %649 = vmatprep.subr.mxu1 %v745_v1  ;;  %v440_v56 = vld [vmem:[%s992_s6 + $0x28] sm:$0xff]  ;;  %v439_v57 = vld [vmem:[%s992_s6 + $0x20] sm:$0xff]  ;;  %v438_v58 = vld [vmem:[%s992_s6 + $0x18] sm:$0xff] }
   0xb   :  { %622 = vmatmul.mubr.msk.f32.gmra.mxu0 %vm49_vm2, %v31_v6  ;;  %650 = vmatpush3.msra.mxu1 %v201_v15  ;;  %v437_v59 = vld [vmem:[%s992_s6 + $0x10] sm:$0xff]  ;;  %v436_v60 = vld [vmem:[%s992_s6 + $0x8] sm:$0xff]  ;;  %v435_v61 = vld [vmem:[%s992_s6] sm:$0xff] }
   0xc   :  { %624 = vmatprep.mubr.msk.f32.mxu0 %vm746_vm1, %v745_v1  ;;  %651 = vmatprep.subr.mxu1 %v745_v1  ;;  %v350_v15 = vld [vmem:[%s990_s4 + $0x40] sm:$0xff] }
   0xd   :  { %652 = vmatpush3.msra.mxu1 %v200_v16  ;;  %v349_v16 = vld [vmem:[%s990_s4 + $0x38] sm:$0xff] }
   0xe   :  { %701 = vmatprep.subr.mxu1 %v745_v1 }
   0xf   :  { %625 = vmatmul.mubr.msk.f32.gmra.mxu0 %vm49_vm2, %v32_v7 }
  0x10   :  { %627 = vmatprep.mubr.msk.f32.mxu0 %vm746_vm1, %v745_v1 }
  0x13   :  { %628 = vmatmul.mubr.msk.f32.gmra.mxu0 %vm49_vm2, %v33_v8 }
  0x14   :  { %630 = vmatprep.mubr.msk.f32.mxu0 %vm746_vm1, %v745_v1 }
  0x17   :  { %631 = vmatmul.mubr.msk.f32.gmra.mxu0 %vm49_vm2, %v34_v9 }
  0x18   :  { %633 = vmatprep.mubr.msk.f32.mxu0 %vm746_vm1, %v745_v1 }
  0x1b   :  { %634 = vmatmul.mubr.msk.f32.gmra.mxu0 %vm49_vm2, %v35_v10 }
  0x1c   :  { %636 = vmatprep.mubr.msk.f32.mxu0 %vm746_vm1, %v745_v1 }
  0x1f   :  { %637 = vmatmul.mubr.msk.f32.gmra.mxu0 %vm49_vm2, %v36_v11 }
  0x20   :  { %639 = vmatprep.mubr.msk.f32.mxu0 %vm746_vm1, %v745_v1 }
  0x23   :  { %640 = vmatmul.mubr.msk.f32.gmra.mxu0 %vm49_vm2, %v37_v12 }
  0x24   :  { %642 = vmatprep.mubr.msk.f32.mxu0 %vm746_vm1, %v745_v1 }
  0x27   :  { %643 = vmatmul.mubr.msk.f32.gmra.mxu0 %vm49_vm2, %v38_v13 }
  0x28   :  { %698 = vmatprep.mubr.msk.f32.mxu0 %vm746_vm1, %v745_v1 }
  0xc7   :  { %v147_v18 = vpop.f32.mrf.mxu0 }
  0xc8   :  { %v148_v19 = vadd.f32 %v544_v17, %v147_v18 }
  0xc9   :  { %v620_v20 = vpop.f32.mrf.mxu0 }
  0xca   :  { %v191_v21 = vmax.f32 %v148_v19, 0.0  ;;  %v348_v19 = vld [vmem:[%s990_s4 + $0x30] sm:$0xff] }
  0xcb   :  { %v152_v22 = vpop.f32.mrf.mxu0 }
  0xcc   :  { %v153_v23 = vadd.f32 %v544_v17, %v152_v22  ;;  %654 = vmatmul.mubr.msk.f32.vlgmr.msra.gmra.mxu1 %vm204_vm3, %v191_v21  ;;  %v347_v22 = vld [vmem:[%s990_s4 + $0x28] sm:$0xff] }
  0xcd   :  { %v623_v24 = vpop.f32.mrf.mxu0  ;;  %656 = vmatprep.mubr.msk.f32.mxu1 %vm746_vm1, %v745_v1  ;;  %702 = vmatpush3.msk.msra.mxu1 %vm454_vm4, %v442_v54 }
  0xce   :  { %v192_v25 = vmax.f32 %v153_v23, 0.0  ;;  %703 = vmatprep.subr.mxu1 %v745_v1  ;;  %v346_v24 = vld [vmem:[%s990_s4 + $0x20] sm:$0xff] }
  0xcf   :  { %v157_v26 = vpop.f32.mrf.mxu0  ;;  %704 = vmatpush3.msra.mxu1 %v441_v55 }
  0xd0   :  { %v158_v27 = vadd.f32 %v544_v17, %v157_v26  ;;  %657 = vmatmul.mubr.msk.f32.gmra.mxu1 %vm204_vm3, %v192_v25  ;;  %705 = vmatprep.subr.mxu1 %v745_v1  ;;  %v345_v26 = vld [vmem:[%s990_s4 + $0x18] sm:$0xff] }
  0xd1   :  { %v626_v28 = vpop.f32.mrf.mxu0  ;;  %659 = vmatprep.mubr.msk.f32.mxu1 %vm746_vm1, %v745_v1  ;;  %706 = vmatpush3.msra.mxu1 %v440_v56 }
  0xd2   :  { %v193_v29 = vmax.f32 %v158_v27, 0.0  ;;  %707 = vmatprep.subr.mxu1 %v745_v1  ;;  %v344_v28 = vld [vmem:[%s990_s4 + $0x10] sm:$0xff] }
  0xd3   :  { %v162_v30 = vpop.f32.mrf.mxu0  ;;  %708 = vmatpush3.msra.mxu1 %v439_v57 }
  0xd4   :  { %v163_v31 = vadd.f32 %v544_v17, %v162_v30  ;;  %660 = vmatmul.mubr.msk.f32.gmra.mxu1 %vm204_vm3, %v193_v29  ;;  %709 = vmatprep.subr.mxu1 %v745_v1  ;;  %v343_v30 = vld [vmem:[%s990_s4 + $0x8] sm:$0xff] }
  0xd5   :  { %v629_v32 = vpop.f32.mrf.mxu0  ;;  %662 = vmatprep.mubr.msk.f32.mxu1 %vm746_vm1, %v745_v1  ;;  %710 = vmatpush3.msra.mxu1 %v438_v58 }
  0xd6   :  { %v194_v33 = vmax.f32 %v163_v31, 0.0  ;;  %711 = vmatprep.subr.mxu1 %v745_v1  ;;  %v342_v32 = vld [vmem:[%s990_s4] sm:$0xff] }
  0xd7   :  { %v167_v34 = vpop.f32.mrf.mxu0  ;;  %712 = vmatpush3.msra.mxu1 %v437_v59 }
  0xd8   :  { %v168_v35 = vadd.f32 %v544_v17, %v167_v34  ;;  %663 = vmatmul.mubr.msk.f32.gmra.mxu1 %vm204_vm3, %v194_v33  ;;  %713 = vmatprep.subr.mxu1 %v745_v1 }
  0xd9   :  { %v632_v36 = vpop.f32.mrf.mxu0  ;;  %665 = vmatprep.mubr.msk.f32.mxu1 %vm746_vm1, %v745_v1  ;;  %714 = vmatpush3.msra.mxu1 %v436_v60 }
  0xda   :  { %v195_v37 = vmax.f32 %v168_v35, 0.0  ;;  %715 = vmatprep.subr.mxu1 %v745_v1  ;;  %v360_v35 = vld [vmem:[%s991_s5] sm:$0x3]  ;;  %s723_s5 = scalar_lea.vmem %s537_s23, 32 }
  0xdb   :  { %v172_v38 = vpop.f32.mrf.mxu0  ;;  %716 = vmatpush3.msra.mxu1 %v435_v61  ;;  %p724_p0 = scmp.ne.s32.totalorder %s537_s23, %s723_s5  ;;  %p729_p2 = scmp.lt.s32.totalorder %s723_s5, %s723_s5 }
  0xdc   :  { %v173_v39 = vadd.f32 %v544_v17, %v172_v38  ;;  %666 = vmatmul.mubr.msk.f32.gmra.mxu1 %vm204_vm3, %v195_v37  ;;  %v565_v38 = vld [vmem:[%s993_s7] ss:$0 sm:$0xff] }
  0xdd   :  { %v635_v40 = vpop.f32.mrf.mxu0  ;;  %668 = vmatprep.mubr.msk.f32.mxu1 %vm746_vm1, %v745_v1  ;;  %p730_p3 = por %p729_p2, %p728_p1 }
  0xde   :  { %v196_v41 = vmax.f32 %v173_v39, 0.0 }
  0xdf   :  { %v177_v42 = vpop.f32.mrf.mxu0  ;;  %p731_p4 = pnand %p730_p3, %p724_p0 }
  0xe0   :  { %v178_v43 = vadd.f32 %v544_v17, %v177_v42  ;;  %669 = vmatmul.mubr.msk.f32.gmra.mxu1 %vm204_vm3, %v196_v41 }
  0xe1   :  { %v638_v44 = vpop.f32.mrf.mxu0  ;;  %671 = vmatprep.mubr.msk.f32.mxu1 %vm746_vm1, %v745_v1 }
  0xe2   :  { %v197_v45 = vmax.f32 %v178_v43, 0.0 }
  0xe3   :  { %v182_v46 = vpop.f32.mrf.mxu0 }
  0xe4   :  { %v183_v47 = vadd.f32 %v544_v17, %v182_v46  ;;  %672 = vmatmul.mubr.msk.f32.gmra.mxu1 %vm204_vm3, %v197_v45 }
  0xe5   :  { %v641_v48 = vpop.f32.mrf.mxu0  ;;  %674 = vmatprep.mubr.msk.f32.mxu1 %vm746_vm1, %v745_v1 }
  0xe6   :  { %v198_v49 = vmax.f32 %v183_v47, 0.0 }
  0xe7   :  { %v187_v50 = vpop.f32.mrf.mxu0 }
  0xe8   :  { %v188_v51 = vadd.f32 %v544_v17, %v187_v50  ;;  %675 = vmatmul.mubr.msk.f32.gmra.mxu1 %vm204_vm3, %v198_v49 }
  0xe9   :  { %v644_v52 = vpop.f32.mrf.mxu0  ;;  %677 = vmatprep.mubr.msk.f32.mxu1 %vm746_vm1, %v745_v1 }
  0xea   :  { %v199_v53 = vmax.f32 %v188_v51, 0.0 }
  0xec   :  { %678 = vmatmul.mubr.msk.f32.gmra.mxu1 %vm204_vm3, %v199_v53 }
  0xed   :  { %717 = vmatprep.mubr.msk.f32.mxu1 %vm746_vm1, %v745_v1 }
 0x18c   :  { %v298_v62 = vpop.f32.mrf.mxu1 }
 0x18d   :  { %v351_v34 = vmul.f32 %v342_v32, %v298_v62 }
 0x18e   :  { %v655_v63 = vpop.f32.mrf.mxu1 }
 0x190   :  { %v303_v0 = vpop.f32.mrf.mxu1 }
 0x191   :  { %v352_v33 = vmul.f32 %v343_v30, %v303_v0 }
 0x192   :  { %v658_v2 = vpop.f32.mrf.mxu1 }
 0x194   :  { %v308_v3 = vpop.f32.mrf.mxu1 }
 0x195   :  { %v353_v31 = vmul.f32 %v344_v28, %v308_v3 }
 0x196   :  { %v661_v4 = vpop.f32.mrf.mxu1 }
 0x198   :  { %v313_v5 = vpop.f32.mrf.mxu1 }
 0x199   :  { %v354_v29 = vmul.f32 %v345_v26, %v313_v5 }
 0x19a   :  { %v664_v6 = vpop.f32.mrf.mxu1 }
 0x19c   :  { %v318_v7 = vpop.f32.mrf.mxu1 }
 0x19d   :  { %v355_v27 = vmul.f32 %v346_v24, %v318_v7 }
 0x19e   :  { %v667_v8 = vpop.f32.mrf.mxu1 }
 0x1a0   :  { %v323_v9 = vpop.f32.mrf.mxu1 }
 0x1a1   :  { %v356_v25 = vmul.f32 %v347_v22, %v323_v9 }
 0x1a2   :  { %v670_v10 = vpop.f32.mrf.mxu1 }
 0x1a4   :  { %v328_v11 = vpop.f32.mrf.mxu1 }
 0x1a5   :  { %v357_v23 = vmul.f32 %v348_v19, %v328_v11 }
 0x1a6   :  { %v673_v12 = vpop.f32.mrf.mxu1 }
 0x1a8   :  { %v333_v13 = vpop.f32.mrf.mxu1 }
 0x1a9   :  { %v358_v21 = vmul.f32 %v349_v16, %v333_v13 }
 0x1aa   :  { %v676_v14 = vpop.f32.mrf.mxu1 }
 0x1ac   :  { %v338_v17 = vpop.f32.mrf.mxu1 }
 0x1ad   :  { %v359_v18 = vmul.f32 %v350_v15, %v338_v17 }
 0x1ae   :  { %v679_v20 = vpop.f32.mrf.mxu1 }
 0x1af   :  { %681 = vmatpush3.msra.mxu0 %v359_v18 }
 0x1b0   :  { %682 = vmatprep.subr.mxu0 %v745_v1 }
 0x1b1   :  { %683 = vmatpush3.msra.mxu0 %v358_v21 }
 0x1b2   :  { %684 = vmatprep.subr.mxu0 %v745_v1 }
 0x1b3   :  { %685 = vmatpush3.msra.mxu0 %v357_v23 }
 0x1b4   :  { %686 = vmatprep.subr.mxu0 %v745_v1 }
 0x1b5   :  { %687 = vmatpush3.msra.mxu0 %v356_v25 }
 0x1b6   :  { %688 = vmatprep.subr.mxu0 %v745_v1 }
 0x1b7   :  { %689 = vmatpush3.msra.mxu0 %v355_v27 }
 0x1b8   :  { %690 = vmatprep.subr.mxu0 %v745_v1 }
 0x1b9   :  { %691 = vmatpush3.msra.mxu0 %v354_v29 }
 0x1ba   :  { %692 = vmatprep.subr.mxu0 %v745_v1 }
 0x1bb   :  { %693 = vmatpush3.msra.mxu0 %v353_v31 }
 0x1bc   :  { %694 = vmatprep.subr.mxu0 %v745_v1 }
 0x1bd   :  { %695 = vmatpush3.msra.mxu0 %v352_v33 }
 0x1be   :  { %696 = vmatprep.subr.mxu0 %v745_v1 }
 0x1bf   :  { %697 = vmatpush3.msra.mxu0 %v351_v34 }
 0x1c0   :  { %699 = vmatmul.mubr.msk.f32.vlgmr.msra.gmra.mxu0 %vm361_vm5, %v360_v35 }
 0x280   :  { %v431_v36 = vpop.f32.mrf.mxu0 }
 0x281   :  { %718 = vmatmul.mubr.msk.f32.vlgmr.msra.gmra.mxu1 %vm450_vm6, %v431_v36 }
 0x282   :  { %v700_v37 = vpop.f32.mrf.mxu0 }
 0x341   :  { %v524_v39 = vpop.f32.mrf.mxu1 }
 0x342   :  { %v525_v40 = vadd.f32 %v565_v38, %v524_v39 }
 0x343   :  { %v719_v41 = vpop.f32.mrf.mxu1 }
 0x344   :  { %529 = vst.msk [vmem:[#allocation2] sm:$0x3] %vm528_vm7, %v525_v40 }
 0x345   :  { %734 = shalt.err (!%p731_p4)
}
 0x346   :  { %539 = dma.vmem_to_hbm [thread:$0]  %s537_s23, 32, %s994_s8, [#allocation3]  }
 0x347   :  { %743 = dma.done.wait [#allocation3], 32  }
 0x348   :  { %744 = vsyncadd [#allocation3], 4294967264 }
 0x349   :  { %543 = vsyncpa [#allocation3], 1 }

</bundles_post_ra>
